<compile_context>
chip_gen: v6e
topology: v6e:2x2x1
jax: 0.10.0
libtpu: 0.0.40
codegen_flags: <defaults>
</compile_context>

<pallas_src>
import jax
import jax.numpy as jnp
from jax.experimental import pallas as pl
from jax.experimental.pallas import tpu as pltpu

# Synthetic "moving window" config (Config().dataset.moving_window):
TIME_WINDOW = 8
PRICE_WINDOW = 8
INPUT_SIZE = TIME_WINDOW * 2 * PRICE_WINDOW  # 128
H0, H1, H2 = 256, 128, 64

# Batch tile (sweepable: 128 / 256 / 512).  256 = one full MXU M pass on
# v6e/v7x and two on v5e.
TB_MAX = 256
TB_MIN = 128


def _batch_tile(n):
    """Largest tile <= TB_MAX; shrink (>= TB_MIN) when the batch is small so
    the grid has >=2 steps and v7x's second TensorCore gets work."""
    tb = TB_MAX
    while tb > TB_MIN and pl.cdiv(n, tb) < 2:
        tb //= 2
    return tb


def _encoder_kernel(x_ref, w0_ref, b0_ref, w1_ref, b1_ref, w2_ref, b2_ref, o_ref):
    # fc0 + ReLU  (bf16 x bf16 -> f32 accumulate on the MXU)
    h = jnp.dot(x_ref[...], w0_ref[...], preferred_element_type=jnp.float32)
    h = jnp.maximum(h + b0_ref[...], 0.0)
    # fc1 + ReLU
    h = jnp.dot(h.astype(jnp.bfloat16), w1_ref[...],
                preferred_element_type=jnp.float32)
    h = jnp.maximum(h + b1_ref[...], 0.0)
    # fc2 + ReLU
    h = jnp.dot(h.astype(jnp.bfloat16), w2_ref[...],
                preferred_element_type=jnp.float32)
    h = jnp.maximum(h + b2_ref[...], 0.0)
    o_ref[...] = h.astype(o_ref.dtype)


@jax.jit
def encoder_forward(x, params):
    """x: any shape whose trailing elements flatten to INPUT_SIZE per row
    (mirrors torch's x.view(-1, input_size)).  Returns (N, 64) float32."""
    w0, b0, w1, b1, w2, b2 = params
    # Glue: flatten exactly like x.view(-1, input_size); bf16 matmul operands.
    x2d = x.reshape(-1, INPUT_SIZE).astype(jnp.bfloat16)
    n = x2d.shape[0]
    tb = _batch_tile(n)

    # PyTorch Linear stores W as (out, in); the kernel consumes (in, out).
    w0t = w0.T.astype(jnp.bfloat16)
    w1t = w1.T.astype(jnp.bfloat16)
    w2t = w2.T.astype(jnp.bfloat16)
    b0r = b0.reshape(1, -1).astype(jnp.float32)
    b1r = b1.reshape(1, -1).astype(jnp.float32)
    b2r = b2.reshape(1, -1).astype(jnp.float32)

    grid = (pl.cdiv(n, tb),)  # no padding: partial tail-tile writes are masked
    out = pl.pallas_call(
        _encoder_kernel,
        out_shape=jax.ShapeDtypeStruct((n, H2), jnp.float32),
        grid_spec=pltpu.PrefetchScalarGridSpec(
            num_scalar_prefetch=0,
            grid=grid,
            in_specs=[
                pl.BlockSpec((tb, INPUT_SIZE), lambda i: (i, 0)),   # x tile
                pl.BlockSpec((INPUT_SIZE, H0), lambda i: (0, 0)),   # w0 (resident)
                pl.BlockSpec((1, H0), lambda i: (0, 0)),            # b0
                pl.BlockSpec((H0, H1), lambda i: (0, 0)),           # w1
                pl.BlockSpec((1, H1), lambda i: (0, 0)),            # b1
                pl.BlockSpec((H1, H2), lambda i: (0, 0)),           # w2
                pl.BlockSpec((1, H2), lambda i: (0, 0)),            # b2
            ],
            out_specs=pl.BlockSpec((tb, H2), lambda i: (i, 0)),
        ),
        compiler_params=pltpu.CompilerParams(
            dimension_semantics=("parallel",),
            vmem_limit_bytes=16 * 1024 * 1024,
        ),
    )(x2d, w0t, b0r, w1t, b1r, w2t, b2r)

    return out


def init_params(key):
    """Deterministic init matching PyTorch Linear shapes: W (out,in), b (out,)."""
    ks = jax.random.split(key, 6)

    def linear(kw, kb, fan_in, fan_out):
        bound = 1.0 / jnp.sqrt(fan_in)
        w = jax.random.uniform(kw, (fan_out, fan_in), jnp.float32, -bound, bound)
        b = jax.random.uniform(kb, (fan_out,), jnp.float32, -bound, bound)
        return w, b

    w0, b0 = linear(ks[0], ks[1], INPUT_SIZE, H0)
    w1, b1 = linear(ks[2], ks[3], H0, H1)
    w2, b2 = linear(ks[4], ks[5], H1, H2)
    return (w0, b0, w1, b1, w2, b2)


def _reference(x, params):
    """Pure-JAX float32 reference matching the PyTorch forward."""
    w0, b0, w1, b1, w2, b2 = params
    h = x.reshape(-1, INPUT_SIZE).astype(jnp.float32)
    h = jnp.maximum(h @ w0.T + b0, 0.0)
    h = jnp.maximum(h @ w1.T + b1, 0.0)
    h = jnp.maximum(h @ w2.T + b2, 0.0)
    return h


if __name__ == "__main__":
    key = jax.random.PRNGKey(0)
    kp, kx1, kx2 = jax.random.split(key, 3)
    params = init_params(kp)

    # (batch, time_window, 2, price_window) sample batch, as the dataset yields.
    x_small = jax.random.normal(kx1, (4, TIME_WINDOW, 2, PRICE_WINDOW), jnp.float32)
    out_small = jax.block_until_ready(encoder_forward(x_small, params))
    ref_small = _reference(x_small, params)
    assert out_small.shape == (4, H2), out_small.shape
    # bf16 matmul operands with f32 accumulation -> loosened tolerance.
    assert jnp.allclose(out_small, ref_small, atol=5e-2, rtol=5e-2), "mismatch (small)"

    # Batch not a multiple of the tile: exercises the masked tail tile and a
    # multi-step ("parallel") grid.
    x_big = jax.random.normal(kx2, (260, INPUT_SIZE), jnp.float32)
    out_big = jax.block_until_ready(encoder_forward(x_big, params))
    ref_big = _reference(x_big, params)
    assert out_big.shape == (260, H2), out_big.shape
    assert jnp.allclose(out_big, ref_big, atol=5e-2, rtol=5e-2), "mismatch (big)"

    print("KERNEL_OK")
</pallas_src>

<mosaic_0001>
module attributes {stable_mosaic.version = 11 : i64} {
  func.func @_encoder_kernel(%arg0: i32, %arg1: memref<128x128xbf16, #tpu.memory_space<vmem>>, %arg2: memref<128x256xbf16, #tpu.memory_space<vmem>>, %arg3: memref<1x256xf32, #tpu.memory_space<vmem>>, %arg4: memref<256x128xbf16, #tpu.memory_space<vmem>>, %arg5: memref<1x128xf32, #tpu.memory_space<vmem>>, %arg6: memref<128x64xbf16, #tpu.memory_space<vmem>>, %arg7: memref<1x64xf32, #tpu.memory_space<vmem>>, %arg8: memref<128x64xf32, #tpu.memory_space<vmem>>) attributes {dimension_semantics = [#tpu.dimension_semantics<parallel>], iteration_bounds = array<i64: 1>, scalar_prefetch = 0 : i64, scratch_operands = 0 : i64, tpu.core_type = #tpu.core_type<tc>, window_params = [{transform_indices = @transform_0, window_bounds = array<i64: 128, 128>}, {pipeline_mode = #tpu.pipeline_mode<synchronous>, transform_indices = @transform_1, window_bounds = array<i64: 128, 256>}, {pipeline_mode = #tpu.pipeline_mode<synchronous>, transform_indices = @transform_2, window_bounds = array<i64: 1, 256>}, {pipeline_mode = #tpu.pipeline_mode<synchronous>, transform_indices = @transform_3, window_bounds = array<i64: 256, 128>}, {pipeline_mode = #tpu.pipeline_mode<synchronous>, transform_indices = @transform_4, window_bounds = array<i64: 1, 128>}, {pipeline_mode = #tpu.pipeline_mode<synchronous>, transform_indices = @transform_5, window_bounds = array<i64: 128, 64>}, {pipeline_mode = #tpu.pipeline_mode<synchronous>, transform_indices = @transform_6, window_bounds = array<i64: 1, 64>}, {transform_indices = @transform_7, window_bounds = array<i64: 128, 64>}]} {
    %c0 = arith.constant 0 : index
    %c0_0 = arith.constant 0 : index
    %0 = vector.load %arg1[%c0, %c0_0] : memref<128x128xbf16, #tpu.memory_space<vmem>>, vector<128x128xbf16>
    %c0_1 = arith.constant 0 : index
    %c0_2 = arith.constant 0 : index
    %1 = vector.load %arg2[%c0_1, %c0_2] : memref<128x256xbf16, #tpu.memory_space<vmem>>, vector<128x256xbf16>
    %cst = arith.constant dense<0.000000e+00> : vector<128x256xf32>
    %2 = tpu.matmul %0, %1, %cst {dimension_numbers = #tpu.dot_dimension_numbers<[1], [0], [0], [1], [0, 0, 1, 1], [], []>} : vector<128x128xbf16>, vector<128x256xbf16>, vector<128x256xf32> -> vector<128x256xf32>
    %c0_3 = arith.constant 0 : index
    %c0_4 = arith.constant 0 : index
    %3 = vector.load %arg3[%c0_3, %c0_4] : memref<1x256xf32, #tpu.memory_space<vmem>>, vector<1x256xf32>
    %4 = vector.broadcast %3 : vector<1x256xf32> to vector<128x256xf32>
    %5 = arith.addf %2, %4 : vector<128x256xf32>
    %cst_5 = arith.constant 0.000000e+00 : f32
    %6 = vector.broadcast %cst_5 : f32 to vector<128x256xf32>
    %7 = arith.maximumf %5, %6 : vector<128x256xf32>
    %8 = arith.truncf %7 : vector<128x256xf32> to vector<128x256xbf16>
    %c0_6 = arith.constant 0 : index
    %c0_7 = arith.constant 0 : index
    %9 = vector.load %arg4[%c0_6, %c0_7] : memref<256x128xbf16, #tpu.memory_space<vmem>>, vector<256x128xbf16>
    %cst_8 = arith.constant dense<0.000000e+00> : vector<128x128xf32>
    %10 = tpu.matmul %8, %9, %cst_8 {dimension_numbers = #tpu.dot_dimension_numbers<[1], [0], [0], [1], [0, 0, 1, 1], [], []>} : vector<128x256xbf16>, vector<256x128xbf16>, vector<128x128xf32> -> vector<128x128xf32>
    %c0_9 = arith.constant 0 : index
    %c0_10 = arith.constant 0 : index
    %11 = vector.load %arg5[%c0_9, %c0_10] : memref<1x128xf32, #tpu.memory_space<vmem>>, vector<1x128xf32>
    %12 = vector.broadcast %11 : vector<1x128xf32> to vector<128x128xf32>
    %13 = arith.addf %10, %12 : vector<128x128xf32>
    %cst_11 = arith.constant 0.000000e+00 : f32
    %14 = vector.broadcast %cst_11 : f32 to vector<128x128xf32>
    %15 = arith.maximumf %13, %14 : vector<128x128xf32>
    %16 = arith.truncf %15 : vector<128x128xf32> to vector<128x128xbf16>
    %c0_12 = arith.constant 0 : index
    %c0_13 = arith.constant 0 : index
    %17 = vector.load %arg6[%c0_12, %c0_13] : memref<128x64xbf16, #tpu.memory_space<vmem>>, vector<128x64xbf16>
    %cst_14 = arith.constant dense<0.000000e+00> : vector<128x64xf32>
    %18 = tpu.matmul %16, %17, %cst_14 {dimension_numbers = #tpu.dot_dimension_numbers<[1], [0], [0], [1], [0, 0, 1, 1], [], []>} : vector<128x128xbf16>, vector<128x64xbf16>, vector<128x64xf32> -> vector<128x64xf32>
    %c0_15 = arith.constant 0 : index
    %c0_16 = arith.constant 0 : index
    %19 = vector.load %arg7[%c0_15, %c0_16] : memref<1x64xf32, #tpu.memory_space<vmem>>, vector<1x64xf32>
    %20 = vector.broadcast %19 : vector<1x64xf32> to vector<128x64xf32>
    %21 = arith.addf %18, %20 : vector<128x64xf32>
    %cst_17 = arith.constant 0.000000e+00 : f32
    %22 = vector.broadcast %cst_17 : f32 to vector<128x64xf32>
    %23 = arith.maximumf %21, %22 : vector<128x64xf32>
    %c0_18 = arith.constant 0 : index
    %c0_19 = arith.constant 0 : index
    %24 = vector.load %arg8[%c0_18, %c0_19] : memref<128x64xf32, #tpu.memory_space<vmem>>, vector<128x64xf32>
    tpu.vector_store %arg8[%c0_18, %c0_19], %23 {strides = array<i32>} : memref<128x64xf32, #tpu.memory_space<vmem>>, vector<128x64xf32>,
    return
  }
  func.func @transform_0(%arg0: i32) -> (i32, i32) {
    %c0_i32 = arith.constant 0 : i32
    %c0_i32_0 = arith.constant 0 : i32
    return %arg0, %c0_i32 : i32, i32
  }
  func.func @transform_1(%arg0: i32) -> (i32, i32) {
    %c0_i32 = arith.constant 0 : i32
    %c0_i32_0 = arith.constant 0 : i32
    %c0_i32_1 = arith.constant 0 : i32
    return %c0_i32, %c0_i32_0 : i32, i32
  }
  func.func @transform_2(%arg0: i32) -> (i32, i32) {
    %c0_i32 = arith.constant 0 : i32
    %c0_i32_0 = arith.constant 0 : i32
    %c0_i32_1 = arith.constant 0 : i32
    return %c0_i32, %c0_i32_0 : i32, i32
  }
  func.func @transform_3(%arg0: i32) -> (i32, i32) {
    %c0_i32 = arith.constant 0 : i32
    %c0_i32_0 = arith.constant 0 : i32
    %c0_i32_1 = arith.constant 0 : i32
    return %c0_i32, %c0_i32_0 : i32, i32
  }
  func.func @transform_4(%arg0: i32) -> (i32, i32) {
    %c0_i32 = arith.constant 0 : i32
    %c0_i32_0 = arith.constant 0 : i32
    %c0_i32_1 = arith.constant 0 : i32
    return %c0_i32, %c0_i32_0 : i32, i32
  }
  func.func @transform_5(%arg0: i32) -> (i32, i32) {
    %c0_i32 = arith.constant 0 : i32
    %c0_i32_0 = arith.constant 0 : i32
    %c0_i32_1 = arith.constant 0 : i32
    return %c0_i32, %c0_i32_0 : i32, i32
  }
  func.func @transform_6(%arg0: i32) -> (i32, i32) {
    %c0_i32 = arith.constant 0 : i32
    %c0_i32_0 = arith.constant 0 : i32
    %c0_i32_1 = arith.constant 0 : i32
    return %c0_i32, %c0_i32_0 : i32, i32
  }
  func.func @transform_7(%arg0: i32) -> (i32, i32) {
    %c0_i32 = arith.constant 0 : i32
    %c0_i32_0 = arith.constant 0 : i32
    return %arg0, %c0_i32 : i32, i32
  }
}

</mosaic_0001>

<bundles_post_ra>
// kernel: encoder_forward.1
= control target key start
LH: loop header
LB: loop body
LE: loop exit
PB: predicated region body
PF: predicated region fallthrough
CT: control target
= control target key end

     0   :  { %12 = vsyncpa [#allocation3], 0  ;;  %v1223_v2 = vmov 0   ;;  %v78_v10 = vlaneseq  ;;  %v1224_v11 = vmov 1983009808   ;;  %vm945_vm0 = vcmask 523264   ;;  %s1597_s0 = inlined_call_operand.vmem [shape: bf16[4,128], index: 0, kind: input, shape index: {}]   ;;  %s1598_s1 = inlined_call_operand.vmem [shape: bf16[128,256], index: 1, kind: input, shape index: {}]   ;;  %s1599_s2 = inlined_call_operand.vmem [shape: f32[1,256], index: 2, kind: input, shape index: {}]   ;;  %s1600_s3 = inlined_call_operand.vmem [shape: bf16[256,128], index: 3, kind: input, shape index: {}]   ;;  %s1601_s4 = inlined_call_operand.vmem [shape: f32[1,128], index: 4, kind: input, shape index: {}]   ;;  %s1602_s5 = inlined_call_operand.vmem [shape: bf16[128,64], index: 5, kind: input, shape index: {}]   ;;  %s1603_s6 = inlined_call_operand.vmem [shape: f32[1,64], index: 6, kind: input, shape index: {}]   ;;  %s1604_s7 = inlined_call_operand.hbm [shape: f32[4,64], index: 7, kind: output, shape index: {}]  }
   0x1   :  { %v1153_v0 = vld [vmem:[%s1598_s1 + $0x74] ss:$8 sps:$4 sm:$0xff]   ;;  %v1155_v1 = vld [vmem:[%s1598_s1 + $0x70] ss:$8 sps:$4 sm:$0xff]   ;;  %376 = vmatprep.mubr.bf16.mxu0 %v1223_v2  ;;  %v1156_v3 = vld [vmem:[%s1598_s1 + $0x64] ss:$8 sps:$4 sm:$0xff]   ;;  %v123_v12 = vunpack.c.l.s4 %v1224_v11 }
   0x2   :  { %344 = vmatprep.subr.bf16.mxu0 %v1153_v0  ;;  %v1158_v4 = vld [vmem:[%s1598_s1 + $0x60] ss:$8 sps:$4 sm:$0xff]   ;;  %v1159_v5 = vld [vmem:[%s1598_s1 + $0x54] ss:$8 sps:$4 sm:$0xff]   ;;  %v1161_v6 = vld [vmem:[%s1598_s1 + $0x50] ss:$8 sps:$4 sm:$0xff]  }
   0x3   :  { %345 = vmatpush1.bf16.msra.mxu0 %v1155_v1  ;;  %v1162_v7 = vld [vmem:[%s1598_s1 + $0x44] ss:$8 sps:$4 sm:$0xff]   ;;  %v1164_v8 = vld [vmem:[%s1598_s1 + $0x40] ss:$8 sps:$4 sm:$0xff]   ;;  %v1165_v9 = vld [vmem:[%s1598_s1 + $0x34] ss:$8 sps:$4 sm:$0xff]   ;;  %v124_v18 = vunpack.c.0.s8 %v123_v12 }
   0x4   :  { %346 = vmatprep.subr.bf16.mxu0 %v1156_v3  ;;  %v1167_v13 = vld [vmem:[%s1598_s1 + $0x30] ss:$8 sps:$4 sm:$0xff]   ;;  %v1168_v14 = vld [vmem:[%s1598_s1 + $0x24] ss:$8 sps:$4 sm:$0xff]   ;;  %v1170_v15 = vld [vmem:[%s1598_s1 + $0x20] ss:$8 sps:$4 sm:$0xff]  }
   0x5   :  { %v28_v16 = vld [vmem:[%s1597_s0] sm:$0x3]  ;;  %v1308_v17 = vshrl.u32 %v78_v10, 7  ;;  %v29_v19 = vld [vmem:[%s1597_s0 + $0x2] sm:$0x3]  ;;  %v1177_v24 = vld [vmem:[%s1600_s3 + $0x78] sm:$0xff]  }
   0x6   :  { %v30_v20 = vld [vmem:[%s1597_s0 + $0x4] sm:$0x3]  ;;  %v31_v21 = vld [vmem:[%s1597_s0 + $0x6] sm:$0x3]  ;;  %v1171_v22 = vld [vmem:[%s1598_s1 + $0x14] ss:$8 sps:$4 sm:$0xff]   ;;  %v120_v26 = vcombine.low %v28_v16, %v29_v19  ;;  %1020 = vmatprep.subr.bf16.mxu1 %v1177_v24 }
   0x7   :  { %347 = vmatpush1.bf16.msra.mxu0 %v1158_v4  ;;  %v1173_v23 = vld [vmem:[%s1598_s1 + $0x10] ss:$8 sps:$4 sm:$0xff]   ;;  %v1174_v25 = vld [vmem:[%s1598_s1 + $0x4] ss:$8 sps:$4 sm:$0xff]   ;;  %v121_v27 = vcombine.low %v30_v20, %v31_v21  ;;  %v1332_v28 = vsub.s32 %v124_v18, %v1308_v17  ;;  %v1176_v32 = vld [vmem:[%s1598_s1] ss:$8 sps:$4 sm:$0xff]  }
   0x8   :  { %348 = vmatprep.subr.bf16.mxu0 %v1159_v5  ;;  %v1178_v29 = vld [vmem:[%s1600_s3 + $0x38] sm:$0xff]   ;;  %v1179_v30 = vld [vmem:[%s1600_s3 + $0x70] sm:$0xff]   ;;  %v32_v33 = vld [vmem:[%s1597_s0 + $0x8] sm:$0x3] }
   0x9   :  { %1021 = vmatpush3.bf16.msra.mxu1 %v1178_v29  ;;  %v1180_v31 = vld [vmem:[%s1600_s3 + $0x30] sm:$0xff]   ;;  %v33_v34 = vld [vmem:[%s1597_s0 + $0xa] sm:$0x3]  ;;  %v128_v36 = vrot.slane %v120_v26, %v1332_v28  ;;  %v135_v37 = vrot.slane %v121_v27, %v1332_v28  ;;  %v34_v38 = vld [vmem:[%s1597_s0 + $0xc] sm:$0x3] }
   0xa   :  { %1022 = vmatprep.subr.bf16.mxu1 %v1179_v30  ;;  %v1181_v35 = vld [vmem:[%s1600_s3 + $0x68] sm:$0xff]   ;;  %v1183_v41 = vld [vmem:[%s1600_s3 + $0x60] sm:$0xff]   ;;  %v137_v43 = vcombine.low %v32_v33, %v33_v34  ;;  %v1185_v46 = vld [vmem:[%s1600_s3 + $0x58] sm:$0xff]  }
   0xb   :  { %349 = vmatpush1.bf16.msra.mxu0 %v1161_v6  ;;  %v35_v39 = vld [vmem:[%s1597_s0 + $0xe] sm:$0x3]  ;;  %v136_v42 = vcombine.low %v128_v36, %v135_v37  ;;  %v1184_v45 = vld [vmem:[%s1600_s3 + $0x20] sm:$0xff]   ;;  %v36_v47 = vld [vmem:[%s1597_s0 + $0x10] sm:$0x3] }
   0xc   :  { %350 = vmatprep.subr.bf16.mxu0 %v1162_v7  ;;  %v1182_v40 = vld [vmem:[%s1600_s3 + $0x28] sm:$0xff]   ;;  %v138_v44 = vcombine.low %v34_v38, %v35_v39  ;;  %v37_v48 = vld [vmem:[%s1597_s0 + $0x12] sm:$0x3]  ;;  %v38_v49 = vld [vmem:[%s1597_s0 + $0x14] sm:$0x3]  ;;  %v145_v51 = vrot.slane %v137_v43, %v1332_v28 }
   0xd   :  { %1023 = vmatpush3.bf16.msra.mxu1 %v1180_v31  ;;  %v39_v50 = vld [vmem:[%s1597_s0 + $0x16] sm:$0x3]  ;;  %v1186_v53 = vld [vmem:[%s1600_s3 + $0x18] sm:$0xff]   ;;  %v154_v55 = vcombine.low %v36_v47, %v37_v48  ;;  %v44_v5 = vld [vmem:[%s1597_s0 + $0x20] sm:$0x3] }
   0xe   :  { %1024 = vmatprep.subr.bf16.mxu1 %v1181_v35  ;;  %v152_v52 = vrot.slane %v138_v44, %v1332_v28  ;;  %v155_v56 = vcombine.low %v38_v49, %v39_v50  ;;  %v40_v59 = vld [vmem:[%s1597_s0 + $0x18] sm:$0x3]  ;;  %v41_v60 = vld [vmem:[%s1597_s0 + $0x1a] sm:$0x3]  ;;  %v42_v61 = vld [vmem:[%s1597_s0 + $0x1c] sm:$0x3] }
   0xf   :  { %351 = vmatpush1.bf16.msra.mxu0 %v1164_v8  ;;  %v162_v57 = vrot.slane %v154_v55, %v1332_v28  ;;  %v43_v62 = vld [vmem:[%s1597_s0 + $0x1e] sm:$0x3]  ;;  %v171_v0 = vcombine.low %v40_v59, %v41_v60  ;;  %v45_v6 = vld [vmem:[%s1597_s0 + $0x22] sm:$0x3]  ;;  %v46_v7 = vld [vmem:[%s1597_s0 + $0x24] sm:$0x3] }
  0x10   :  { %352 = vmatprep.subr.bf16.mxu0 %v1165_v9  ;;  %v153_v54 = vcombine.low %v145_v51, %v152_v52  ;;  %v169_v58 = vrot.slane %v155_v56, %v1332_v28  ;;  %v172_v1 = vcombine.low %v42_v61, %v43_v62  ;;  %v47_v8 = vld [vmem:[%s1597_s0 + $0x26] sm:$0x3]  ;;  %v188_v10 = vcombine.low %v44_v5, %v45_v6  ;;  %v50_v16 = vld [vmem:[%s1597_s0 + $0x2c] sm:$0x3]  ;;  %v51_v18 = vld [vmem:[%s1597_s0 + $0x2e] sm:$0x3] }
  0x11   :  { %1025 = vmatpush3.bf16.msra.mxu1 %v1182_v40  ;;  %v179_v3 = vrot.slane %v171_v0, %v1332_v28  ;;  %v189_v11 = vcombine.low %v46_v7, %v47_v8  ;;  %v206_v21 = vcombine.low %v50_v16, %v51_v18  ;;  %v52_v24 = vld [vmem:[%s1597_s0 + $0x30] sm:$0x3]  ;;  %v54_v26 = vld [vmem:[%s1597_s0 + $0x34] sm:$0x3]  ;;  %v55_v27 = vld [vmem:[%s1597_s0 + $0x36] sm:$0x3] }
  0x12   :  { %1026 = vmatprep.subr.bf16.mxu1 %v1183_v41  ;;  %v170_v63 = vcombine.low %v162_v57, %v169_v58  ;;  %v186_v4 = vrot.slane %v172_v1, %v1332_v28  ;;  %v196_v12 = vrot.slane %v188_v10, %v1332_v28  ;;  %v223_v31 = vcombine.low %v54_v26, %v55_v27  ;;  %v56_v34 = vld [vmem:[%s1597_s0 + $0x38] sm:$0x3]  ;;  %v57_v35 = vld [vmem:[%s1597_s0 + $0x3a] sm:$0x3]  ;;  %v58_v36 = vld [vmem:[%s1597_s0 + $0x3c] sm:$0x3] }
  0x13   :  { %353 = vmatpush1.bf16.msra.mxu0 %v1167_v13  ;;  %v203_v13 = vrot.slane %v189_v11, %v1332_v28  ;;  %v59_v37 = vld [vmem:[%s1597_s0 + $0x3e] sm:$0x3]  ;;  %v239_v39 = vcombine.low %v56_v34, %v57_v35  ;;  %v1187_v44 = vld [vmem:[%s1600_s3 + $0x50] sm:$0xff]   ;;  %v1192_v47 = vld [vmem:[%s1600_s3] sm:$0xff]   ;;  %v84_v51 = vsub.s32 1, %v1308_v17  ;;  %v80_v52 = vsub.s32 0, %v1308_v17 }
  0x14   :  { %354 = vmatprep.subr.bf16.mxu0 %v1168_v14  ;;  %v187_v9 = vcombine.low %v179_v3, %v186_v4  ;;  %v48_v14 = vld [vmem:[%s1597_s0 + $0x28] sm:$0x3]  ;;  %v237_v33 = vrot.slane %v223_v31, %v1332_v28  ;;  %v240_v40 = vcombine.low %v58_v36, %v59_v37  ;;  %v1193_v48 = vld [vmem:[%s1602_s5 + $0x38] sm:$0xff]   ;;  %v1194_v49 = vld [vmem:[%s1602_s5 + $0x30] sm:$0xff]  }
  0x15   :  { %1027 = vmatpush3.bf16.msra.mxu1 %v1184_v45  ;;  %v204_v19 = vcombine.low %v196_v12, %v203_v13  ;;  %v247_v41 = vrot.slane %v239_v39, %v1332_v28  ;;  %v1188_v45 = vld [vmem:[%s1600_s3 + $0x10] sm:$0xff]   ;;  %v1195_v50 = vld [vmem:[%s1602_s5 + $0x28] sm:$0xff]  }
  0x16   :  { %1028 = vmatprep.subr.bf16.mxu1 %v1185_v46  ;;  %v1189_v46 = vld [vmem:[%s1600_s3 + $0x48] sm:$0xff]  }
  0x17   :  { %355 = vmatpush1.bf16.msra.mxu0 %v1170_v15  ;;  %v49_v15 = vld [vmem:[%s1597_s0 + $0x2a] sm:$0x3] }
  0x18   :  { %356 = vmatprep.subr.bf16.mxu0 %v1171_v22  ;;  %v205_v20 = vcombine.low %v48_v14, %v49_v15 }
  0x19   :  { %1029 = vmatpush3.bf16.msra.mxu1 %v1186_v53  ;;  %v76_v53 = vld [vmem:[%s1599_s2] sm:$0x3] }
  0x1a   :  { %v213_v22 = vrot.slane %v205_v20, %v1332_v28  ;;  %1030 = vmatprep.subr.bf16.mxu1 %v1187_v44  ;;  %v1503_v55 = vrot.slane %v76_v53, %v84_v51  ;;  %v1505_v56 = vrot.slane %v76_v53, %v80_v52 }
  0x1b   :  { %357 = vmatpush1.bf16.msra.mxu0 %v1173_v23  ;;  %v220_v23 = vrot.slane %v206_v21, %v1332_v28 }
  0x1c   :  { %358 = vmatprep.subr.bf16.mxu0 %v1174_v25  ;;  %v53_v25 = vld [vmem:[%s1597_s0 + $0x32] sm:$0x3] }
  0x1d   :  { %v221_v29 = vcombine.low %v213_v22, %v220_v23  ;;  %v222_v30 = vcombine.low %v52_v24, %v53_v25  ;;  %1031 = vmatpush3.bf16.msra.mxu1 %v1188_v45 }
  0x1e   :  { %1032 = vmatprep.subr.bf16.mxu1 %v1189_v46 }
  0x1f   :  { %359 = vmatpush1.bf16.msra.mxu0 %v1176_v32  ;;  %v230_v32 = vrot.slane %v222_v30, %v1332_v28 }
  0x20   :  { %1100 = vmatprep.subr.bf16.mxu0 %v1193_v48 }
  0x21   :  { %v238_v38 = vcombine.low %v230_v32, %v237_v33 }
  0x22   :  { %377 = vmatmul.mubr.bf16.vlgmr.msra.gmra.mxu0 %v136_v42  ;;  %v254_v42 = vrot.slane %v240_v40, %v1332_v28  ;;  %v1191_v28 = vld [vmem:[%s1600_s3 + $0x40] sm:$0xff]  }
  0x23   :  { %386 = vmatprep.mubr.bf16.mxu0 %v1223_v2  ;;  %1101 = vmatpush3.bf16.msra.mxu0 %v1193_v48 }
  0x24   :  { %v255_v43 = vcombine.low %v247_v41, %v254_v42  ;;  %1102 = vmatprep.subr.bf16.mxu0 %v1194_v49 }
  0x27   :  { %1103 = vmatpush3.bf16.msra.mxu0 %v1194_v49 }
  0x28   :  { %1104 = vmatprep.subr.bf16.mxu0 %v1195_v50 }
  0x2a   :  { %387 = vmatmul.mubr.bf16.gmra.mxu0 %v153_v54 }
  0x2b   :  { %396 = vmatprep.mubr.bf16.mxu0 %v1223_v2  ;;  %1105 = vmatpush3.bf16.msra.mxu0 %v1195_v50 }
  0x32   :  { %397 = vmatmul.mubr.bf16.gmra.mxu0 %v170_v63 }
  0x33   :  { %406 = vmatprep.mubr.bf16.mxu0 %v1223_v2 }
  0x3a   :  { %407 = vmatmul.mubr.bf16.gmra.mxu0 %v187_v9 }
  0x3b   :  { %416 = vmatprep.mubr.bf16.mxu0 %v1223_v2 }
  0x42   :  { %417 = vmatmul.mubr.bf16.gmra.mxu0 %v204_v19 }
  0x43   :  { %426 = vmatprep.mubr.bf16.mxu0 %v1223_v2 }
  0x4a   :  { %427 = vmatmul.mubr.bf16.gmra.mxu0 %v221_v29 }
  0x4b   :  { %436 = vmatprep.mubr.bf16.mxu0 %v1223_v2 }
  0x52   :  { %437 = vmatmul.mubr.bf16.gmra.mxu0 %v238_v38 }
  0x53   :  { %446 = vmatprep.mubr.bf16.mxu0 %v1223_v2  ;;  %v1190_v2 = vld [vmem:[%s1600_s3 + $0x8] sm:$0xff]  }
  0x54   :  { %1033 = vmatpush3.bf16.msra.mxu1 %v1190_v2 }
  0x55   :  { %1034 = vmatprep.subr.bf16.mxu1 %v1191_v28 }
  0x58   :  { %1035 = vmatpush3.bf16.msra.mxu1 %v1192_v47 }
  0x59   :  { %1132 = vmatprep.subr.bf16.mxu1 %v1193_v48 }
  0x5a   :  { %447 = vmatmul.mubr.bf16.gmra.mxu0 %v255_v43 }
  0xe2   :  { %v378_v54 = vpop.f32.mrf.mxu0 }
  0xe3   :  { %v379_v61 = vadd.f32 %v378_v54, %v1505_v56 }
  0xe4   :  { %v380_v57 = vpop.f32.mrf.mxu0 }
  0xe5   :  { %v381_v59 = vadd.f32 %v380_v57, %v1503_v55  ;;  %v457_v4 = vmax.f32 %v379_v61, 0.0 }
  0xe6   :  { %v382_v58 = vpop.f32.mrf.mxu0 }
  0xe7   :  { %v383_v60 = vadd.f32 %v382_v58, %v1505_v56  ;;  %v458_v1 = vmax.f32 %v381_v59, 0.0 }
  0xe8   :  { %v384_v62 = vpop.f32.mrf.mxu0 }
  0xe9   :  { %v385_v17 = vadd.f32 %v384_v62, %v1503_v55  ;;  %v459_v63 = vmax.f32 %v383_v60, 0.0 }
  0xea   :  { %v388_v0 = vpop.f32.mrf.mxu0 }
  0xeb   :  { %v460_v3 = vmax.f32 %v385_v17, 0.0  ;;  %v489_v7 = vpack.c.bf16 %v459_v63, %v457_v4  ;;  %v389_v11 = vadd.f32 %v388_v0, %v1505_v56 }
  0xec   :  { %v390_v5 = vpop.f32.mrf.mxu0 }
  0xed   :  { %v490_v6 = vpack.c.bf16 %v460_v3, %v458_v1  ;;  %v391_v9 = vadd.f32 %v390_v5, %v1503_v55  ;;  %v461_v19 = vmax.f32 %v389_v11, 0.0 }
  0xee   :  { %v392_v8 = vpop.f32.mrf.mxu0 }
  0xef   :  { %v393_v10 = vadd.f32 %v392_v8, %v1505_v56  ;;  %672 = vmatprep.mubr.bf16.mxu1 %v490_v6  ;;  %v462_v16 = vmax.f32 %v391_v9, 0.0 }
  0xf0   :  { %v394_v12 = vpop.f32.mrf.mxu0  ;;  %673 = vmatmul.mubr.bf16.vlgmr.msra.gmra.mxu1 %v489_v7 }
  0xf1   :  { %v395_v13 = vadd.f32 %v394_v12, %v1503_v55  ;;  %1140 = vmatpush3.bf16.msra.mxu1 %v1193_v48  ;;  %v463_v14 = vmax.f32 %v393_v10, 0.0 }
  0xf2   :  { %v398_v15 = vpop.f32.mrf.mxu0  ;;  %1133 = vmatprep.subr.bf16.mxu1 %v1194_v49 }
  0xf3   :  { %v464_v18 = vmax.f32 %v395_v13, 0.0  ;;  %v491_v22 = vpack.c.bf16 %v463_v14, %v461_v19  ;;  %v399_v26 = vadd.f32 %v398_v15, %v1505_v56 }
  0xf4   :  { %v400_v20 = vpop.f32.mrf.mxu0 }
  0xf5   :  { %v492_v21 = vpack.c.bf16 %v464_v18, %v462_v16  ;;  %1141 = vmatpush3.bf16.msra.mxu1 %v1194_v49  ;;  %v401_v24 = vadd.f32 %v400_v20, %v1503_v55  ;;  %v465_v34 = vmax.f32 %v399_v26, 0.0 }
  0xf6   :  { %v402_v23 = vpop.f32.mrf.mxu0  ;;  %1134 = vmatprep.subr.bf16.mxu1 %v1195_v50 }
  0xf7   :  { %v403_v25 = vadd.f32 %v402_v23, %v1505_v56  ;;  %680 = vmatprep.mubr.bf16.mxu1 %v492_v21  ;;  %v466_v32 = vmax.f32 %v401_v24, 0.0 }
  0xf8   :  { %v404_v27 = vpop.f32.mrf.mxu0  ;;  %681 = vmatmul.mubr.bf16.gmra.mxu1 %v491_v22 }
  0xf9   :  { %v405_v29 = vadd.f32 %v404_v27, %v1503_v55  ;;  %1142 = vmatpush3.bf16.msra.mxu1 %v1195_v50  ;;  %v467_v30 = vmax.f32 %v403_v25, 0.0 }
  0xfa   :  { %v408_v31 = vpop.f32.mrf.mxu0 }
  0xfb   :  { %v468_v33 = vmax.f32 %v405_v29, 0.0  ;;  %v493_v37 = vpack.c.bf16 %v467_v30, %v465_v34  ;;  %v409_v41 = vadd.f32 %v408_v31, %v1505_v56 }
  0xfc   :  { %v410_v35 = vpop.f32.mrf.mxu0 }
  0xfd   :  { %v494_v36 = vpack.c.bf16 %v468_v33, %v466_v32  ;;  %v411_v39 = vadd.f32 %v410_v35, %v1503_v55  ;;  %v469_v28 = vmax.f32 %v409_v41, 0.0 }
  0xfe   :  { %v412_v38 = vpop.f32.mrf.mxu0 }
  0xff   :  { %v413_v40 = vadd.f32 %v412_v38, %v1505_v56  ;;  %688 = vmatprep.mubr.bf16.mxu1 %v494_v36  ;;  %v470_v46 = vmax.f32 %v411_v39, 0.0 }
 0x100   :  { %v414_v42 = vpop.f32.mrf.mxu0  ;;  %689 = vmatmul.mubr.bf16.gmra.mxu1 %v493_v37 }
 0x101   :  { %v415_v43 = vadd.f32 %v414_v42, %v1503_v55  ;;  %v471_v44 = vmax.f32 %v413_v40, 0.0 }
 0x102   :  { %v418_v45 = vpop.f32.mrf.mxu0 }
 0x103   :  { %v472_v2 = vmax.f32 %v415_v43, 0.0  ;;  %v495_v49 = vpack.c.bf16 %v471_v44, %v469_v28  ;;  %v419_v53 = vadd.f32 %v418_v45, %v1505_v56  ;;  %v1196_v44 = vld [vmem:[%s1602_s5 + $0x20] sm:$0xff]   ;;  %v1199_v45 = vld [vmem:[%s1602_s5 + $0x8] sm:$0xff]  }
 0x104   :  { %v420_v47 = vpop.f32.mrf.mxu0  ;;  %1106 = vmatprep.subr.bf16.mxu0 %v1196_v44  ;;  %1135 = vmatprep.subr.bf16.mxu1 %v1196_v44 }
 0x105   :  { %v496_v48 = vpack.c.bf16 %v472_v2, %v470_v46  ;;  %v421_v51 = vadd.f32 %v420_v47, %v1503_v55  ;;  %v473_v62 = vmax.f32 %v419_v53, 0.0  ;;  %1107 = vmatpush3.bf16.msra.mxu0 %v1196_v44  ;;  %1143 = vmatpush3.bf16.msra.mxu1 %v1196_v44  ;;  %v1200_v46 = vld [vmem:[%s1602_s5] sm:$0xff]  }
 0x106   :  { %v422_v50 = vpop.f32.mrf.mxu0 }
 0x107   :  { %v423_v52 = vadd.f32 %v422_v50, %v1505_v56  ;;  %696 = vmatprep.mubr.bf16.mxu1 %v496_v48  ;;  %v474_v60 = vmax.f32 %v421_v51, 0.0  ;;  %v1557_v48 = vld [vmem:[%s1601_s4] ss:$0 sm:$0xff] }
 0x108   :  { %v424_v54 = vpop.f32.mrf.mxu0  ;;  %697 = vmatmul.mubr.bf16.gmra.mxu1 %v495_v49 }
 0x109   :  { %v425_v57 = vadd.f32 %v424_v54, %v1503_v55  ;;  %v475_v58 = vmax.f32 %v423_v52, 0.0 }
 0x10a   :  { %v428_v59 = vpop.f32.mrf.mxu0 }
 0x10b   :  { %v476_v61 = vmax.f32 %v425_v57, 0.0  ;;  %v497_v0 = vpack.c.bf16 %v475_v58, %v473_v62  ;;  %v429_v5 = vadd.f32 %v428_v59, %v1505_v56 }
 0x10c   :  { %v430_v17 = vpop.f32.mrf.mxu0 }
 0x10d   :  { %v498_v63 = vpack.c.bf16 %v476_v61, %v474_v60  ;;  %v431_v3 = vadd.f32 %v430_v17, %v1503_v55  ;;  %v477_v12 = vmax.f32 %v429_v5, 0.0 }
 0x10e   :  { %v432_v1 = vpop.f32.mrf.mxu0 }
 0x10f   :  { %v433_v4 = vadd.f32 %v432_v1, %v1505_v56  ;;  %704 = vmatprep.mubr.bf16.mxu1 %v498_v63  ;;  %v478_v10 = vmax.f32 %v431_v3, 0.0 }
 0x110   :  { %v434_v6 = vpop.f32.mrf.mxu0  ;;  %705 = vmatmul.mubr.bf16.gmra.mxu1 %v497_v0 }
 0x111   :  { %v435_v7 = vadd.f32 %v434_v6, %v1503_v55  ;;  %v479_v8 = vmax.f32 %v433_v4, 0.0 }
 0x112   :  { %v438_v9 = vpop.f32.mrf.mxu0 }
 0x113   :  { %v480_v11 = vmax.f32 %v435_v7, 0.0  ;;  %v499_v15 = vpack.c.bf16 %v479_v8, %v477_v12  ;;  %v439_v20 = vadd.f32 %v438_v9, %v1505_v56 }
 0x114   :  { %v440_v13 = vpop.f32.mrf.mxu0 }
 0x115   :  { %v500_v14 = vpack.c.bf16 %v480_v11, %v478_v10  ;;  %v441_v18 = vadd.f32 %v440_v13, %v1503_v55  ;;  %v481_v27 = vmax.f32 %v439_v20, 0.0 }
 0x116   :  { %v442_v16 = vpop.f32.mrf.mxu0 }
 0x117   :  { %v443_v19 = vadd.f32 %v442_v16, %v1505_v56  ;;  %712 = vmatprep.mubr.bf16.mxu1 %v500_v14  ;;  %v482_v25 = vmax.f32 %v441_v18, 0.0 }
 0x118   :  { %v444_v21 = vpop.f32.mrf.mxu0  ;;  %713 = vmatmul.mubr.bf16.gmra.mxu1 %v499_v15 }
 0x119   :  { %v445_v22 = vadd.f32 %v444_v21, %v1503_v55  ;;  %v483_v23 = vmax.f32 %v443_v19, 0.0 }
 0x11a   :  { %v448_v24 = vpop.f32.mrf.mxu0 }
 0x11b   :  { %v484_v26 = vmax.f32 %v445_v22, 0.0  ;;  %v501_v31 = vpack.c.bf16 %v483_v23, %v481_v27  ;;  %v449_v35 = vadd.f32 %v448_v24, %v1505_v56 }
 0x11c   :  { %v450_v29 = vpop.f32.mrf.mxu0 }
 0x11d   :  { %v502_v30 = vpack.c.bf16 %v484_v26, %v482_v25  ;;  %v451_v33 = vadd.f32 %v450_v29, %v1503_v55  ;;  %v485_v41 = vmax.f32 %v449_v35, 0.0 }
 0x11e   :  { %v452_v32 = vpop.f32.mrf.mxu0 }
 0x11f   :  { %v453_v34 = vadd.f32 %v452_v32, %v1505_v56  ;;  %720 = vmatprep.mubr.bf16.mxu1 %v502_v30  ;;  %v486_v39 = vmax.f32 %v451_v33, 0.0  ;;  %v1198_v56 = vld [vmem:[%s1602_s5 + $0x10] sm:$0xff]  }
 0x120   :  { %v454_v36 = vpop.f32.mrf.mxu0  ;;  %721 = vmatmul.mubr.bf16.gmra.mxu1 %v501_v31 }
 0x121   :  { %v455_v37 = vadd.f32 %v454_v36, %v1503_v55  ;;  %v487_v38 = vmax.f32 %v453_v34, 0.0  ;;  %v1197_v55 = vld [vmem:[%s1602_s5 + $0x18] sm:$0xff]  }
 0x122   :  { %1108 = vmatprep.subr.bf16.mxu0 %v1197_v55  ;;  %1136 = vmatprep.subr.bf16.mxu1 %v1197_v55 }
 0x123   :  { %v488_v40 = vmax.f32 %v455_v37, 0.0  ;;  %v503_v43 = vpack.c.bf16 %v487_v38, %v485_v41  ;;  %1109 = vmatpush3.bf16.msra.mxu0 %v1197_v55  ;;  %1144 = vmatpush3.bf16.msra.mxu1 %v1197_v55 }
 0x124   :  { %1110 = vmatprep.subr.bf16.mxu0 %v1198_v56  ;;  %1137 = vmatprep.subr.bf16.mxu1 %v1198_v56 }
 0x125   :  { %v504_v42 = vpack.c.bf16 %v488_v40, %v486_v39 }
 0x127   :  { %728 = vmatprep.mubr.bf16.mxu1 %v504_v42  ;;  %1111 = vmatpush3.bf16.msra.mxu0 %v1198_v56 }
 0x128   :  { %729 = vmatmul.mubr.bf16.gmra.mxu1 %v503_v43  ;;  %1112 = vmatprep.subr.bf16.mxu0 %v1199_v45 }
 0x129   :  { %1145 = vmatpush3.bf16.msra.mxu1 %v1198_v56 }
 0x12a   :  { %1138 = vmatprep.subr.bf16.mxu1 %v1199_v45 }
 0x12b   :  { %1113 = vmatpush3.bf16.msra.mxu0 %v1199_v45 }
 0x12c   :  { %1114 = vmatprep.subr.bf16.mxu0 %v1200_v46 }
 0x12d   :  { %1146 = vmatpush3.bf16.msra.mxu1 %v1199_v45 }
 0x12e   :  { %1139 = vmatprep.subr.bf16.mxu1 %v1200_v46 }
 0x12f   :  { %1115 = vmatpush3.bf16.msra.mxu0 %v1200_v46 }
 0x131   :  { %1147 = vmatpush3.bf16.msra.mxu1 %v1200_v46 }
 0x1b0   :  { %v1036_v2 = vpop.f32.mrf.mxu1 }
 0x1b2   :  { %v1037_v28 = vpop.f32.mrf.mxu1 }
 0x1b3   :  { %v1038_v47 = vadd.f32 %v1037_v28, %v1036_v2 }
 0x1b4   :  { %v1039_v49 = vpop.f32.mrf.mxu1 }
 0x1b5   :  { %v675_v51 = vadd.f32 %v1038_v47, %v1557_v48 }
 0x1b6   :  { %v1040_v50 = vpop.f32.mrf.mxu1 }
 0x1b7   :  { %v1041_v52 = vadd.f32 %v1040_v50, %v1039_v49  ;;  %v737_v58 = vmax.f32 %v675_v51, 0.0 }
 0x1b8   :  { %v1042_v53 = vpop.f32.mrf.mxu1 }
 0x1b9   :  { %v678_v54 = vadd.f32 %v1041_v52, %v1557_v48 }
 0x1ba   :  { %v1043_v57 = vpop.f32.mrf.mxu1 }
 0x1bb   :  { %v738_v59 = vmax.f32 %v678_v54, 0.0  ;;  %v1044_v60 = vadd.f32 %v1043_v57, %v1042_v53 }
 0x1bc   :  { %v1045_v61 = vpop.f32.mrf.mxu1 }
 0x1bd   :  { %v753_v62 = vpack.c.bf16 %v738_v59, %v737_v58  ;;  %v683_v63 = vadd.f32 %v1044_v60, %v1557_v48 }
 0x1be   :  { %v1046_v17 = vpop.f32.mrf.mxu1 }
 0x1bf   :  { %v1047_v0 = vadd.f32 %v1046_v17, %v1045_v61  ;;  %1116 = vmatprep.mubr.bf16.mxu0 %v753_v62  ;;  %v739_v5 = vmax.f32 %v683_v63, 0.0 }
 0x1c0   :  { %v1048_v1 = vpop.f32.mrf.mxu1 }
 0x1c1   :  { %v686_v3 = vadd.f32 %v1047_v0, %v1557_v48 }
 0x1c2   :  { %v1049_v4 = vpop.f32.mrf.mxu1 }
 0x1c3   :  { %v740_v6 = vmax.f32 %v686_v3, 0.0  ;;  %v1050_v7 = vadd.f32 %v1049_v4, %v1048_v1 }
 0x1c4   :  { %v1051_v8 = vpop.f32.mrf.mxu1 }
 0x1c5   :  { %v754_v9 = vpack.c.bf16 %v740_v6, %v739_v5  ;;  %v691_v11 = vadd.f32 %v1050_v7, %v1557_v48 }
 0x1c6   :  { %v1052_v10 = vpop.f32.mrf.mxu1 }
 0x1c7   :  { %v1053_v12 = vadd.f32 %v1052_v10, %v1051_v8  ;;  %1117 = vmatmul.mubr.bf16.vlgmr.msra.gmra.mxu0 %v754_v9  ;;  %v741_v16 = vmax.f32 %v691_v11, 0.0  ;;  %v1011_v9 = vld [vmem:[%s1603_s6] ss:$0 sm:$0xff] }
 0x1c8   :  { %v1054_v13 = vpop.f32.mrf.mxu1 }
 0x1c9   :  { %v694_v14 = vadd.f32 %v1053_v12, %v1557_v48 }
 0x1ca   :  { %v1055_v15 = vpop.f32.mrf.mxu1 }
 0x1cb   :  { %v742_v18 = vmax.f32 %v694_v14, 0.0  ;;  %v1056_v19 = vadd.f32 %v1055_v15, %v1054_v13 }
 0x1cc   :  { %v1057_v20 = vpop.f32.mrf.mxu1 }
 0x1cd   :  { %v755_v21 = vpack.c.bf16 %v742_v18, %v741_v16  ;;  %v699_v23 = vadd.f32 %v1056_v19, %v1557_v48 }
 0x1ce   :  { %v1058_v22 = vpop.f32.mrf.mxu1 }
 0x1cf   :  { %v1059_v24 = vadd.f32 %v1058_v22, %v1057_v20  ;;  %1120 = vmatprep.mubr.bf16.mxu0 %v755_v21  ;;  %v743_v29 = vmax.f32 %v699_v23, 0.0 }
 0x1d0   :  { %v1060_v25 = vpop.f32.mrf.mxu1 }
 0x1d1   :  { %v702_v26 = vadd.f32 %v1059_v24, %v1557_v48 }
 0x1d2   :  { %v1061_v27 = vpop.f32.mrf.mxu1 }
 0x1d3   :  { %v744_v30 = vmax.f32 %v702_v26, 0.0  ;;  %v1062_v31 = vadd.f32 %v1061_v27, %v1060_v25 }
 0x1d4   :  { %v1063_v32 = vpop.f32.mrf.mxu1 }
 0x1d5   :  { %v756_v33 = vpack.c.bf16 %v744_v30, %v743_v29  ;;  %v707_v35 = vadd.f32 %v1062_v31, %v1557_v48 }
 0x1d6   :  { %v1064_v34 = vpop.f32.mrf.mxu1 }
 0x1d7   :  { %v1065_v36 = vadd.f32 %v1064_v34, %v1063_v32  ;;  %1121 = vmatmul.mubr.bf16.gmra.mxu0 %v756_v33  ;;  %v745_v40 = vmax.f32 %v707_v35, 0.0 }
 0x1d8   :  { %v1066_v37 = vpop.f32.mrf.mxu1 }
 0x1d9   :  { %v710_v38 = vadd.f32 %v1065_v36, %v1557_v48 }
 0x1da   :  { %v1067_v39 = vpop.f32.mrf.mxu1 }
 0x1db   :  { %v746_v41 = vmax.f32 %v710_v38, 0.0  ;;  %v1068_v42 = vadd.f32 %v1067_v39, %v1066_v37 }
 0x1dc   :  { %v1069_v43 = vpop.f32.mrf.mxu1 }
 0x1dd   :  { %v757_v44 = vpack.c.bf16 %v746_v41, %v745_v40  ;;  %v715_v56 = vadd.f32 %v1068_v42, %v1557_v48 }
 0x1de   :  { %v1070_v55 = vpop.f32.mrf.mxu1 }
 0x1df   :  { %v1071_v45 = vadd.f32 %v1070_v55, %v1069_v43  ;;  %1124 = vmatprep.mubr.bf16.mxu1 %v757_v44  ;;  %v747_v47 = vmax.f32 %v715_v56, 0.0 }
 0x1e0   :  { %v1072_v46 = vpop.f32.mrf.mxu1 }
 0x1e1   :  { %v718_v2 = vadd.f32 %v1071_v45, %v1557_v48 }
 0x1e2   :  { %v1073_v28 = vpop.f32.mrf.mxu1 }
 0x1e3   :  { %v748_v49 = vmax.f32 %v718_v2, 0.0  ;;  %v1074_v50 = vadd.f32 %v1073_v28, %v1072_v46 }
 0x1e4   :  { %v1075_v51 = vpop.f32.mrf.mxu1 }
 0x1e5   :  { %v758_v52 = vpack.c.bf16 %v748_v49, %v747_v47  ;;  %v723_v54 = vadd.f32 %v1074_v50, %v1557_v48 }
 0x1e6   :  { %v1076_v53 = vpop.f32.mrf.mxu1 }
 0x1e7   :  { %v1077_v57 = vadd.f32 %v1076_v53, %v1075_v51  ;;  %1125 = vmatmul.mubr.bf16.vlgmr.msra.gmra.mxu1 %v758_v52  ;;  %v749_v61 = vmax.f32 %v723_v54, 0.0 }
 0x1e8   :  { %v1078_v58 = vpop.f32.mrf.mxu1 }
 0x1e9   :  { %v726_v59 = vadd.f32 %v1077_v57, %v1557_v48 }
 0x1ea   :  { %v1079_v60 = vpop.f32.mrf.mxu1 }
 0x1eb   :  { %v750_v62 = vmax.f32 %v726_v59, 0.0  ;;  %v1080_v17 = vadd.f32 %v1079_v60, %v1078_v58 }
 0x1ec   :  { %v1081_v63 = vpop.f32.mrf.mxu1 }
 0x1ed   :  { %v759_v0 = vpack.c.bf16 %v750_v62, %v749_v61  ;;  %v731_v3 = vadd.f32 %v1080_v17, %v1557_v48 }
 0x1ee   :  { %v1082_v1 = vpop.f32.mrf.mxu1 }
 0x1ef   :  { %v1083_v4 = vadd.f32 %v1082_v1, %v1081_v63  ;;  %1128 = vmatprep.mubr.bf16.mxu1 %v759_v0  ;;  %v751_v6 = vmax.f32 %v731_v3, 0.0 }
 0x1f1   :  { %v734_v5 = vadd.f32 %v1083_v4, %v1557_v48 }
 0x1f3   :  { %v752_v7 = vmax.f32 %v734_v5, 0.0 }
 0x1f5   :  { %v760_v8 = vpack.c.bf16 %v752_v7, %v751_v6 }
 0x1f7   :  { %1129 = vmatmul.mubr.bf16.gmra.mxu1 %v760_v8 }
 0x287   :  { %v1118_v10 = vpop.f32.mrf.mxu0 }
 0x288   :  { %v875_v11 = vadd.f32 %v1118_v10, %v1011_v9 }
 0x289   :  { %v866_v12 = vpop.f32.mrf.mxu0 }
 0x28a   :  { %v931_v13 = vmax.f32 %v875_v11, 0.0  ;;  %v867_v14 = vadd.f32 %v1011_v9, %v866_v12 }
 0x28b   :  { %v1119_v15 = vpop.f32.mrf.mxu0 }
 0x28c   :  { %948 = vst.msk [vmem:[#allocation2 + $0x10] sm:$0xff] %vm945_vm0, %v931_v13  ;;  %v929_v16 = vmax.f32 %v867_v14, 0.0  ;;  %v878_v18 = vadd.f32 %v1119_v15, %v1011_v9 }
 0x28d   :  { %v869_v48 = vpop.f32.mrf.mxu0 }
 0x28e   :  { %946 = vst.msk [vmem:[#allocation2] sm:$0xff] %vm945_vm0, %v929_v16  ;;  %v932_v19 = vmax.f32 %v878_v18, 0.0  ;;  %v870_v20 = vadd.f32 %v1011_v9, %v869_v48 }
 0x290   :  { %949 = vst.msk [vmem:[#allocation2 + $0x18] sm:$0xff] %vm945_vm0, %v932_v19  ;;  %v930_v21 = vmax.f32 %v870_v20, 0.0 }
 0x292   :  { %947 = vst.msk [vmem:[#allocation2 + $0x8] sm:$0xff] %vm945_vm0, %v930_v21 }
 0x297   :  { %v1122_v22 = vpop.f32.mrf.mxu0 }
 0x298   :  { %v891_v23 = vadd.f32 %v1122_v22, %v1011_v9 }
 0x299   :  { %v882_v24 = vpop.f32.mrf.mxu0 }
 0x29a   :  { %v935_v25 = vmax.f32 %v891_v23, 0.0  ;;  %v883_v26 = vadd.f32 %v1011_v9, %v882_v24 }
 0x29b   :  { %v1123_v27 = vpop.f32.mrf.mxu0 }
 0x29c   :  { %952 = vst.msk [vmem:[#allocation2 + $0x30] sm:$0xff] %vm945_vm0, %v935_v25  ;;  %v933_v29 = vmax.f32 %v883_v26, 0.0  ;;  %v894_v30 = vadd.f32 %v1123_v27, %v1011_v9 }
 0x29d   :  { %v885_v31 = vpop.f32.mrf.mxu0 }
 0x29e   :  { %950 = vst.msk [vmem:[#allocation2 + $0x20] sm:$0xff] %vm945_vm0, %v933_v29  ;;  %v936_v32 = vmax.f32 %v894_v30, 0.0  ;;  %v886_v33 = vadd.f32 %v1011_v9, %v885_v31 }
 0x2a0   :  { %953 = vst.msk [vmem:[#allocation2 + $0x38] sm:$0xff] %vm945_vm0, %v936_v32  ;;  %v934_v34 = vmax.f32 %v886_v33, 0.0 }
 0x2a2   :  { %951 = vst.msk [vmem:[#allocation2 + $0x28] sm:$0xff] %vm945_vm0, %v934_v34 }
 0x2a7   :  { %v1126_v35 = vpop.f32.mrf.mxu1 }
 0x2a8   :  { %v907_v36 = vadd.f32 %v1126_v35, %v1011_v9 }
 0x2a9   :  { %v898_v37 = vpop.f32.mrf.mxu1 }
 0x2aa   :  { %v939_v38 = vmax.f32 %v907_v36, 0.0  ;;  %v899_v39 = vadd.f32 %v1011_v9, %v898_v37 }
 0x2ab   :  { %v1127_v40 = vpop.f32.mrf.mxu1 }
 0x2ac   :  { %956 = vst.msk [vmem:[#allocation2 + $0x50] sm:$0xff] %vm945_vm0, %v939_v38  ;;  %v937_v41 = vmax.f32 %v899_v39, 0.0  ;;  %v910_v42 = vadd.f32 %v1127_v40, %v1011_v9 }
 0x2ad   :  { %v901_v43 = vpop.f32.mrf.mxu1 }
 0x2ae   :  { %954 = vst.msk [vmem:[#allocation2 + $0x40] sm:$0xff] %vm945_vm0, %v937_v41  ;;  %v940_v44 = vmax.f32 %v910_v42, 0.0  ;;  %v902_v55 = vadd.f32 %v1011_v9, %v901_v43 }
 0x2b0   :  { %957 = vst.msk [vmem:[#allocation2 + $0x58] sm:$0xff] %vm945_vm0, %v940_v44  ;;  %v938_v56 = vmax.f32 %v902_v55, 0.0 }
 0x2b2   :  { %955 = vst.msk [vmem:[#allocation2 + $0x48] sm:$0xff] %vm945_vm0, %v938_v56 }
 0x2b7   :  { %v1130_v45 = vpop.f32.mrf.mxu1 }
 0x2b8   :  { %v923_v46 = vadd.f32 %v1130_v45, %v1011_v9 }
 0x2b9   :  { %v914_v2 = vpop.f32.mrf.mxu1 }
 0x2ba   :  { %v943_v28 = vmax.f32 %v923_v46, 0.0  ;;  %v915_v47 = vadd.f32 %v1011_v9, %v914_v2 }
 0x2bb   :  { %v1131_v49 = vpop.f32.mrf.mxu1 }
 0x2bc   :  { %960 = vst.msk [vmem:[#allocation2 + $0x70] sm:$0xff] %vm945_vm0, %v943_v28  ;;  %v941_v50 = vmax.f32 %v915_v47, 0.0  ;;  %v926_v51 = vadd.f32 %v1131_v49, %v1011_v9 }
 0x2bd   :  { %v917_v52 = vpop.f32.mrf.mxu1 }
 0x2be   :  { %958 = vst.msk [vmem:[#allocation2 + $0x60] sm:$0xff] %vm945_vm0, %v941_v50  ;;  %v944_v53 = vmax.f32 %v926_v51, 0.0  ;;  %v918_v54 = vadd.f32 %v1011_v9, %v917_v52 }
 0x2c0   :  { %961 = vst.msk [vmem:[#allocation2 + $0x78] sm:$0xff] %vm945_vm0, %v944_v53  ;;  %v942_v57 = vmax.f32 %v918_v54, 0.0 }
 0x2c2   :  { %959 = vst.msk [vmem:[#allocation2 + $0x68] sm:$0xff] %vm945_vm0, %v942_v57 }
 0x2c3   :  { %966 = vsyncadd [#allocation3], 1984  ;;  %s1225_s6 = smov [#allocation2]  }
 0x2c4   :  { %s967_s26 = sshll.u32 %s1225_s6, 4  ;;  %s968_s26 = int_to_ptr.vmem [resolvable:$true] %s967_s26 }
 0x2c5   :  { %s1201_s27 = scalar_lea.vmem %s968_s26, 64  ;;  %s1205_s28 = scalar_lea.vmem %s968_s26, 2048 }
 0x2c6   :  { %p1202_p0 = scmp.ne.s32.totalorder %s968_s26, %s1201_s27  ;;  %p1206_p1 = scmp.lt.s32.totalorder %s968_s26, %s968_s26 }
 0x2c7   :  { %p1207_p2 = scmp.lt.s32.totalorder %s1205_s28, %s1201_s27 }
 0x2c9   :  { %p1208_p3 = por %p1207_p2, %p1206_p1 }
 0x2cb   :  { %p1209_p4 = pnand %p1208_p3, %p1202_p0 }
 0x2cd   :  { %1212 = shalt.err (!%p1209_p4)
}
 0x2ce   :  { %s1226_s29 = smov 64   ;;  %s1227_s30 = smov 4  }
 0x2cf   :  { %973 = dma.vmem_to_hbm [thread:$0]  %s968_s26, 64, %s1604_s7, [#allocation3], %s1226_s29, %s1226_s29, %s1227_s30  }
 0x2d0   :  { %1221 = dma.done.wait [#allocation3], 2048  }
 0x2d1   :  { %1222 = vsyncadd [#allocation3], 4294965248 }
 0x2d2   :  { %977 = vsyncpa [#allocation3], 1 }

</bundles_post_ra>
